<compile_context>
chip_gen: v7x
topology: tpu7x:2x2x1
jax: 0.10.0
libtpu: 0.0.40
codegen_flags: <defaults>
</compile_context>

<pallas_src>
import jax
import jax.numpy as jnp
from jax.experimental import pallas as pl
from jax.experimental.pallas import tpu as pltpu

_MIB = 1024 * 1024


def _gating_kernel(x_ref, mu_ref, o_ref):
    # x_ref: (tb, td) block, mu_ref: (1, td) gate slice for this D block.
    # Broadcast multiply over the batch/sublane axis (one VPU mul per vreg).
    o_ref[...] = x_ref[...] * mu_ref[...]


def _chip_vmem_bytes():
    """Physical VMEM per core; conservative (v7x-like) default if unknown."""
    try:
        info = pltpu.get_tpu_info()
        cap = int(getattr(info, "vmem_capacity_bytes", 0))
        if cap > 0:
            return cap
    except Exception:
        pass
    return 64 * _MIB


def _choose_tiles(B, D, itemsize, budget, max_rows):
    """Pick (tb, td).

    Prefer full-row tiles (td = D) so every HBM DMA is contiguous; only split
    the feature axis when a single sublane-row strip exceeds the budget.
    Caller guarantees D % 128 == 0 on this path.
    """
    sublane = max(8, 32 // itemsize)  # 8 (f32) / 16 (bf16) / 32 (int8, fp8)
    row_bytes = D * itemsize

    if sublane * row_bytes <= budget:
        td = D
        rows_fit = budget // row_bytes
        tb = min(max_rows, (rows_fit // sublane) * sublane)
        tb = max(tb, sublane)
    else:
        cols_fit = budget // (sublane * itemsize)
        td = max(128, (cols_fit // 128) * 128)
        tb = sublane

    if B <= tb:
        tb = B  # full-extent batch block is always legal
        # v7x has 2 TensorCores: never collapse to a single grid block if we
        # can legally split the batch axis (harmless extra step on 1-TC chips).
        if B >= 2 * sublane:
            half = -(-B // 2)                   # cdiv(B, 2)
            tb = -(-half // sublane) * sublane  # round up to sublane packing
    return tb, td


def gating_forward(x, mu, *, tb=None, td=None, min_pallas_bytes=None,
                   donate_x=False):
    """GatingLayer forward: new_x = x * mu (mu broadcast along the batch axis)."""
    B, D = x.shape
    assert mu.shape == (D,)
    # NOTE: if x is lower precision than mu (e.g. bf16 x, f32 mu), PyTorch
    # promotes the product to f32; we gate in x's dtype instead.  For the
    # standard f32-in / f32-gate case the two are identical.
    mu = mu.astype(x.dtype)

    itemsize = jnp.dtype(x.dtype).itemsize
    vmem_cap = _chip_vmem_bytes()
    big_vmem = vmem_cap >= 100 * _MIB        # v5e/v6e: 128 MiB, v7x: 64 MiB

    if min_pallas_bytes is None:
        # v7x's 3.2 TB/s HBM makes the fixed launch/pipeline cost a larger
        # relative tax -> hand small multiplies to XLA so they can fuse.
        min_pallas_bytes = (4 if big_vmem else 8) * _MIB

    # XLA fallback for tiny problems and for non-128-aligned feature dims:
    # a lane-sparse output forces masked vst.msk partial stores (the biggest
    # measured writeback penalty); the fused XLA multiply is strictly better.
    if (x.size * itemsize < min_pallas_bytes) or (D % 128 != 0):
        return x * mu[None, :]

    budget = (10 if big_vmem else 4) * _MIB
    max_rows = 2048 if big_vmem else 1024
    auto_tb, auto_td = _choose_tiles(B, D, itemsize, budget, max_rows)
    tb = auto_tb if tb is None else tb
    td = auto_td if td is None else td

    # Scoped-VMEM request derived from the actual footprint:
    # double-buffered input + output tiles + double-buffered mu + slack.
    tile_bytes = tb * td * itemsize
    footprint = 4 * tile_bytes + 2 * td * itemsize + 2 * _MIB
    vmem_limit = int(min(max(footprint, 16 * _MIB), vmem_cap - 16 * _MIB))
    if footprint > vmem_limit:
        # Manual tb/td too large for this chip -- stay correct, fall back.
        return x * mu[None, :]

    mu2d = mu.reshape(1, D)
    # Feature (D) axis OUTERMOST: mu's block index only changes on the outer
    # axis, so Pallas re-DMAs it once per D block, not once per grid step.
    grid = (pl.cdiv(D, td), pl.cdiv(B, tb))

    return pl.pallas_call(
        _gating_kernel,
        out_shape=jax.ShapeDtypeStruct((B, D), x.dtype),
        grid_spec=pltpu.PrefetchScalarGridSpec(
            num_scalar_prefetch=0,
            grid=grid,
            in_specs=[
                pl.BlockSpec((tb, td), lambda j, i: (i, j)),   # x
                pl.BlockSpec((1, td), lambda j, i: (0, j)),    # mu (follows D)
            ],
            out_specs=pl.BlockSpec((tb, td), lambda j, i: (i, j)),
        ),
        compiler_params=pltpu.CompilerParams(
            dimension_semantics=("parallel", "parallel"),
            vmem_limit_bytes=vmem_limit,
        ),
        # Optionally reuse x's HBM buffer for the output when x is dead after
        # gating (memory-tight serving configs).
        input_output_aliases=({0: 0} if donate_x else {}),
    )(x, mu2d)


def gating_regularizer(mu):
    """L1 regularizer: sum(|mu|). Tiny scalar reduction; plain JAX is fine."""
    return jnp.sum(jnp.abs(mu))


if __name__ == "__main__":
    key = jax.random.PRNGKey(0)
    k = jax.random.split(key, 8)

    # 1) Small (batch, input_dim), forced through the Pallas path.
    B, D = 8, 128
    x = jax.random.normal(k[0], (B, D), dtype=jnp.float32)
    mu = 0.01 * jax.random.normal(k[1], (D,), dtype=jnp.float32)
    out = jax.block_until_ready(gating_forward(x, mu, min_pallas_bytes=0))
    ref = x * mu[None, :]
    assert out.shape == ref.shape and out.dtype == ref.dtype
    assert jnp.allclose(out, ref, atol=1e-6, rtol=1e-6)

    # 2) Multi-step grid on both axes (D outer): validates mu index_map (0, j).
    B2, D2 = 24, 256
    x2 = jax.random.normal(k[2], (B2, D2), dtype=jnp.float32)
    mu2 = 0.01 * jax.random.normal(k[3], (D2,), dtype=jnp.float32)
    out2 = jax.block_until_ready(
        gating_forward(x2, mu2, tb=8, td=128, min_pallas_bytes=0))
    assert jnp.allclose(out2, x2 * mu2[None, :], atol=1e-6, rtol=1e-6)

    # 3) Auto tiles with B big enough to force >= 2 batch blocks (v7x 2-TC).
    B3, D3 = 32, 128
    x3 = jax.random.normal(k[4], (B3, D3), dtype=jnp.float32)
    mu3 = 0.01 * jax.random.normal(k[5], (D3,), dtype=jnp.float32)
    out3 = jax.block_until_ready(gating_forward(x3, mu3, min_pallas_bytes=0))
    assert jnp.allclose(out3, x3 * mu3[None, :], atol=1e-6, rtol=1e-6)

    # 4) bf16 activations: sublane-16 batch tiling, Pallas path.
    x4 = jax.random.normal(k[6], (32, 256), dtype=jnp.bfloat16)
    mu4 = (0.01 * jax.random.normal(k[7], (256,), dtype=jnp.float32))
    out4 = jax.block_until_ready(gating_forward(x4, mu4, min_pallas_bytes=0))
    ref4 = x4 * mu4.astype(jnp.bfloat16)[None, :]
    assert jnp.allclose(out4.astype(jnp.float32), ref4.astype(jnp.float32),
                        atol=1e-2, rtol=1e-2)

    # 5) Non-128-aligned D -> XLA fallback (lane-sparse stores avoided).
    x5 = jax.random.normal(k[0], (16, 96), dtype=jnp.float32)
    mu5 = 0.01 * jax.random.normal(k[1], (96,), dtype=jnp.float32)
    out5 = jax.block_until_ready(gating_forward(x5, mu5, min_pallas_bytes=0))
    assert jnp.allclose(out5, x5 * mu5[None, :], atol=1e-6, rtol=1e-6)

    # 6) Tiny-problem auto-dispatch (plain XLA multiply, fusable).
    out6 = jax.block_until_ready(gating_forward(x, mu))
    assert jnp.allclose(out6, ref, atol=1e-6, rtol=1e-6)

    # Exercise the L1 regularizer (not part of forward, just a reduction).
    _ = jax.block_until_ready(gating_regularizer(mu))

    print("KERNEL_OK")
</pallas_src>

<mosaic_0001>
module attributes {stable_mosaic.version = 11 : i64} {
  func.func @_gating_kernel(%arg0: i32, %arg1: i32, %arg2: memref<8x128xf32, #tpu.memory_space<vmem>>, %arg3: memref<1x128xf32, #tpu.memory_space<vmem>>, %arg4: memref<8x128xf32, #tpu.memory_space<vmem>>) attributes {dimension_semantics = [#tpu.dimension_semantics<parallel>, #tpu.dimension_semantics<parallel>], iteration_bounds = array<i64: 1, 1>, scalar_prefetch = 0 : i64, scratch_operands = 0 : i64, tpu.core_type = #tpu.core_type<tc>, window_params = [{transform_indices = @transform_0, window_bounds = array<i64: 8, 128>}, {transform_indices = @transform_1, window_bounds = array<i64: 1, 128>}, {transform_indices = @transform_2, window_bounds = array<i64: 8, 128>}]} {
    %c0 = arith.constant 0 : index
    %c0_0 = arith.constant 0 : index
    %0 = vector.load %arg2[%c0, %c0_0] : memref<8x128xf32, #tpu.memory_space<vmem>>, vector<8x128xf32>
    %c0_1 = arith.constant 0 : index
    %c0_2 = arith.constant 0 : index
    %1 = vector.load %arg3[%c0_1, %c0_2] : memref<1x128xf32, #tpu.memory_space<vmem>>, vector<1x128xf32>
    %2 = vector.broadcast %1 : vector<1x128xf32> to vector<8x128xf32>
    %3 = arith.mulf %0, %2 : vector<8x128xf32>
    %c0_3 = arith.constant 0 : index
    %c0_4 = arith.constant 0 : index
    %4 = vector.load %arg4[%c0_3, %c0_4] : memref<8x128xf32, #tpu.memory_space<vmem>>, vector<8x128xf32>
    tpu.vector_store %arg4[%c0_3, %c0_4], %3 {strides = array<i32>} : memref<8x128xf32, #tpu.memory_space<vmem>>, vector<8x128xf32>,
    return
  }
  func.func @transform_0(%arg0: i32, %arg1: i32) -> (i32, i32) {
    %c0_i32 = arith.constant 0 : i32
    return %arg1, %arg0 : i32, i32
  }
  func.func @transform_1(%arg0: i32, %arg1: i32) -> (i32, i32) {
    %c0_i32 = arith.constant 0 : i32
    %c0_i32_0 = arith.constant 0 : i32
    return %c0_i32, %arg0 : i32, i32
  }
  func.func @transform_2(%arg0: i32, %arg1: i32) -> (i32, i32) {
    %c0_i32 = arith.constant 0 : i32
    return %arg1, %arg0 : i32, i32
  }
}

</mosaic_0001>

<bundles_post_ra>
// kernel: tpu_custom_call.1
= control target key start
LH: loop header
LB: loop body
LE: loop exit
PB: predicated region body
PF: predicated region fallthrough
CT: control target
= control target key end

     0   :  { %7 = vsyncpa [#allocation3], 0  ;;  %s144_s0 = inlined_call_operand.hbm [shape: f32[8,128], index: 0, kind: input, shape index: {}]   ;;  %s145_s1 = inlined_call_operand.vmem [shape: f32[1,128], index: 1, kind: input, shape index: {}]   ;;  %s146_s2 = inlined_call_operand.hbm [shape: f32[8,128], index: 2, kind: output, shape index: {}]  }
   0x1   :  { %8 = vsyncpa [#allocation4], 0  ;;  %s100_s9 = smov [#allocation2]   ;;  %s52_s13 = scalar_lea.hbm %s144_s0, 128 }
   0x2   :  { %s15_s10 = sshll.u32 %s100_s9, 4  ;;  %p53_p0 = scmp.ne.s32.totalorder %s144_s0, %s52_s13  ;;  %s16_s10 = int_to_ptr.vmem [resolvable:$true] %s15_s10 }
   0x3   :  { %p56_p1 = scmp.lt.u32.totalorder %s52_s13, %s144_s0 }
   0x5   :  { %p58_p2 = pnand %p56_p1, %p53_p0 }
   0x7   :  { %61 = shalt.err (!%p58_p2)
}
   0x8   :  { %s62_s18 = scalar_lea.vmem %s16_s10, 128  ;;  %p67_p4 = scmp.lt.s32.totalorder %s16_s10, %s16_s10 }
   0x9   :  { %p63_p3 = scmp.ne.s32.totalorder %s16_s10, %s62_s18  ;;  %p68_p5 = scmp.lt.s32.totalorder %s62_s18, %s62_s18 }
   0xb   :  { %p69_p6 = por %p68_p5, %p67_p4 }
   0xd   :  { %p70_p7 = pnand %p69_p6, %p63_p3 }
   0xf   :  { %73 = shalt.err (!%p70_p7)
}
  0x10   :  { %18 = dma.hbm_to_vmem [thread:$0]  %s144_s0, 128, %s16_s10, [#allocation3]  }
  0x11   :  { %96 = dma.done.wait [#allocation3], 128  }
  0x12   :  { %97 = vsyncadd [#allocation3], 4294967168  ;;  %s101_s21 = smov [#allocation5]   ;;  %v24_v0 = vld [vmem:[#allocation2] sm:$0xff] }
  0x13   :  { %s40_s22 = sshll.u32 %s101_s21, 4  ;;  %v49_v1 = vld [vmem:[%s145_s1] ss:$0 sm:$0xff]  ;;  %s41_s22 = int_to_ptr.vmem [resolvable:$true] %s40_s22 }
  0x14   :  { %v32_v2 = vmul.f32 %v49_v1, %v24_v0  ;;  %s74_s25 = scalar_lea.vmem %s41_s22, 128  ;;  %p79_p9 = scmp.lt.s32.totalorder %s41_s22, %s41_s22 }
  0x15   :  { %p75_p8 = scmp.ne.s32.totalorder %s41_s22, %s74_s25  ;;  %p80_p10 = scmp.lt.s32.totalorder %s74_s25, %s74_s25 }
  0x16   :  { %33 = vst [vmem:[#allocation5] sm:$0xff] %v32_v2 }
  0x17   :  { %p81_p11 = por %p80_p10, %p79_p9 }
  0x19   :  { %p82_p12 = pnand %p81_p11, %p75_p8 }
  0x1b   :  { %85 = shalt.err (!%p82_p12)
}
  0x1c   :  { %s86_s27 = scalar_lea.hbm %s146_s2, 128 }
  0x1d   :  { %p87_p13 = scmp.ne.s32.totalorder %s146_s2, %s86_s27  ;;  %p90_p0 = scmp.lt.u32.totalorder %s86_s27, %s146_s2 }
  0x1f   :  { %p92_p1 = pnand %p90_p0, %p87_p13 }
  0x21   :  { %95 = shalt.err (!%p92_p1)
}
  0x22   :  { %43 = dma.vmem_to_hbm [thread:$0]  %s41_s22, 128, %s146_s2, [#allocation4]  }
  0x23   :  { %98 = dma.done.wait [#allocation4], 128  }
  0x24   :  { %99 = vsyncadd [#allocation4], 4294967168 }
  0x25   :  { %47 = vsyncpa [#allocation3], 1 }
  0x26   :  { %48 = vsyncpa [#allocation4], 1 }

</bundles_post_ra>
